<compile_context>
chip_gen: v7x
topology: tpu7x:2x2x1
jax: 0.10.0
libtpu: 0.0.40
codegen_flags: <defaults>
</compile_context>

<pallas_src>
import jax
import jax.numpy as jnp
from jax.experimental import pallas as pl
from jax.experimental.pallas import tpu as pltpu

_LANE = 128
_BLK_ROWS = 512                       # (512, 128) f32 block = 256 KiB per operand
_BLK_ELEMS = _BLK_ROWS * _LANE        # elements per grid block
_NUM_CORES = 2                        # leading "parallel" axis (megacore / v7x)


def _make_kernel(cum_blocks, weights, blocks_per_core):
    """Fused weighted-SSE kernel.

    cum_blocks      : tuple of python ints, cumulative block count per segment
    weights         : tuple of python floats, 1/N for each segment
    blocks_per_core : python int, inner grid extent
    """
    nseg = len(weights)

    def kernel(p_ref, t_ref, o_ref):
        i = pl.program_id(1)

        # Initialize this core's resident accumulator block at the start of its
        # reduction sweep (output block index depends only on the core axis).
        @pl.when(i == 0)
        def _():
            o_ref[...] = jnp.zeros_like(o_ref)

        # Per-block weight = 1/N of the segment this block belongs to. Segment
        # boundaries are static, so this is a tiny chain of scalar selects.
        g = pl.program_id(0) * blocks_per_core + i
        w = jnp.float32(weights[nseg - 1])
        for k in range(nseg - 2, -1, -1):
            w = jnp.where(g < cum_blocks[k], jnp.float32(weights[k]), w)

        d = p_ref[...].astype(jnp.float32) - t_ref[...].astype(jnp.float32)
        o_ref[...] += w * (d * d)          # pure elementwise VPU work, no XLU

    return kernel


def _fused_weighted_sse(pairs):
    """sum_i mean((pred_i - true_i)^2) for a list of (pred, true) pairs.

    All pairs must be non-empty and shape-matched.  Runs a single Pallas
    reduction kernel over the concatenated, block-padded flattened data.
    """
    flats_p, flats_t, weights, cum_blocks = [], [], [], []
    total_blocks = 0
    for pred, true in pairs:
        assert pred.shape == true.shape, (
            f"pred/true shape mismatch: {pred.shape} vs {true.shape}")
        n = pred.size
        fp = jnp.ravel(pred)
        ft = jnp.ravel(true)
        pad = (-n) % _BLK_ELEMS
        if pad:  # zero padding in BOTH operands -> (p - t)^2 contribution is 0
            fp = jnp.pad(fp, (0, pad))
            ft = jnp.pad(ft, (0, pad))
        flats_p.append(fp)
        flats_t.append(ft)
        weights.append(1.0 / float(n))
        total_blocks += fp.size // _BLK_ELEMS
        cum_blocks.append(total_blocks)

    blocks_per_core = -(-total_blocks // _NUM_CORES)     # ceil div (python int)
    padded_blocks = blocks_per_core * _NUM_CORES
    tail = (padded_blocks - total_blocks) * _BLK_ELEMS

    p_flat = flats_p[0] if len(flats_p) == 1 else jnp.concatenate(flats_p)
    t_flat = flats_t[0] if len(flats_t) == 1 else jnp.concatenate(flats_t)
    if tail:
        p_flat = jnp.pad(p_flat, (0, tail))
        t_flat = jnp.pad(t_flat, (0, tail))

    rows = padded_blocks * _BLK_ROWS
    p2 = p_flat.reshape(rows, _LANE)
    t2 = t_flat.reshape(rows, _LANE)

    kernel = _make_kernel(tuple(cum_blocks), tuple(weights), blocks_per_core)

    # Each core accumulates into its own lane-dense (512, 128) output block,
    # written back to HBM once; the (tiny) final reduce happens in the wrapper.
    partials = pl.pallas_call(
        kernel,
        out_shape=jax.ShapeDtypeStruct((_NUM_CORES * _BLK_ROWS, _LANE),
                                       jnp.float32),
        grid_spec=pltpu.PrefetchScalarGridSpec(
            num_scalar_prefetch=0,
            grid=(_NUM_CORES, blocks_per_core),
            in_specs=[
                pl.BlockSpec((_BLK_ROWS, _LANE),
                             lambda c, i, b=blocks_per_core: (c * b + i, 0)),
                pl.BlockSpec((_BLK_ROWS, _LANE),
                             lambda c, i, b=blocks_per_core: (c * b + i, 0)),
            ],
            out_specs=pl.BlockSpec((_BLK_ROWS, _LANE), lambda c, i: (c, 0)),
        ),
        compiler_params=pltpu.CompilerParams(
            dimension_semantics=("parallel", "arbitrary")),
    )(p2, t2)

    return jnp.sum(partials)


def train_loss_forward(masked_pred_epsX, masked_pred_epsE, pred_y,
                       true_epsX, true_epsE, true_y, log=False):
    """Pallas-backed equivalent of TrainLoss.forward (returns the scalar loss)."""
    pairs = []
    if true_epsX.size > 0:
        pairs.append((masked_pred_epsX, true_epsX))
    if true_epsE.size > 0:
        pairs.append((masked_pred_epsE, true_epsE))
    if true_y.size > 0:
        pairs.append((pred_y, true_y))
    if not pairs:
        return jnp.float32(0.0)
    # TODO(synk): wandb logging / torchmetrics running state (compute()/reset())
    # has no kernel equivalent; only the returned scalar loss is reproduced.
    return _fused_weighted_sse(pairs)


if __name__ == "__main__":
    key = jax.random.PRNGKey(0)
    ks = jax.random.split(key, 6)

    bs, n, dx, de, dy = 2, 8, 4, 5, 12
    masked_pred_epsX = jax.random.normal(ks[0], (bs, n, dx), dtype=jnp.float32)
    true_epsX        = jax.random.normal(ks[1], (bs, n, dx), dtype=jnp.float32)
    masked_pred_epsE = jax.random.normal(ks[2], (bs, n, n, de), dtype=jnp.float32)
    true_epsE        = jax.random.normal(ks[3], (bs, n, n, de), dtype=jnp.float32)
    pred_y           = jax.random.normal(ks[4], (bs, dy), dtype=jnp.float32)
    true_y           = jax.random.normal(ks[5], (bs, dy), dtype=jnp.float32)

    loss = train_loss_forward(masked_pred_epsX, masked_pred_epsE, pred_y,
                              true_epsX, true_epsE, true_y, log=False)
    loss = jax.block_until_ready(loss)

    # Reference check in plain JAX.
    ref = (jnp.mean((masked_pred_epsX - true_epsX) ** 2)
           + jnp.mean((masked_pred_epsE - true_epsE) ** 2)
           + jnp.mean((pred_y - true_y) ** 2))
    assert jnp.allclose(loss, ref, rtol=1e-5, atol=1e-5), (loss, ref)

    print("KERNEL_OK")
</pallas_src>

<mosaic_0001>
module attributes {stable_mosaic.version = 11 : i64} {
  func.func @kernel(%arg0: i32, %arg1: i32, %arg2: memref<512x128xf32, #tpu.memory_space<vmem>>, %arg3: memref<512x128xf32, #tpu.memory_space<vmem>>, %arg4: memref<512x128xf32, #tpu.memory_space<vmem>>) attributes {dimension_semantics = [#tpu.dimension_semantics<parallel>, #tpu.dimension_semantics<arbitrary>], iteration_bounds = array<i64: 2, 2>, scalar_prefetch = 0 : i64, scratch_operands = 0 : i64, tpu.core_type = #tpu.core_type<tc>, window_params = [{transform_indices = @transform_0, window_bounds = array<i64: 512, 128>}, {transform_indices = @transform_1, window_bounds = array<i64: 512, 128>}, {transform_indices = @transform_2, window_bounds = array<i64: 512, 128>}]} {
    %c0_i32 = arith.constant 0 : i32
    %0 = arith.cmpi eq, %arg1, %c0_i32 : i32
    %1 = arith.extui %0 : i1 to i32
    %c0_i32_0 = arith.constant 0 : i32
    %2 = arith.cmpi ne, %1, %c0_i32_0 : i32
    scf.if %2 {
      %cst_11 = arith.constant 0.000000e+00 : f32
      %18 = vector.broadcast %cst_11 : f32 to vector<512x128xf32>
      %c0_12 = arith.constant 0 : index
      %c0_13 = arith.constant 0 : index
      %19 = vector.load %arg4[%c0_12, %c0_13] : memref<512x128xf32, #tpu.memory_space<vmem>>, vector<512x128xf32>
      tpu.vector_store %arg4[%c0_12, %c0_13], %18 {strides = array<i32>} : memref<512x128xf32, #tpu.memory_space<vmem>>, vector<512x128xf32>,
    } else {
    }
    %c2_i32 = arith.constant 2 : i32
    %3 = arith.muli %arg0, %c2_i32 : i32
    %4 = arith.addi %3, %arg1 : i32
    %c2_i32_1 = arith.constant 2 : i32
    %5 = arith.cmpi slt, %4, %c2_i32_1 : i32
    %cst = arith.constant 1.562500e-03 : f32
    %cst_2 = arith.constant 0.0416666679 : f32
    %6 = arith.select %5, %cst, %cst_2 : f32
    %c1_i32 = arith.constant 1 : i32
    %7 = arith.cmpi slt, %4, %c1_i32 : i32
    %cst_3 = arith.constant 1.562500e-02 : f32
    %8 = arith.select %7, %cst_3, %6 : f32
    %c0 = arith.constant 0 : index
    %c0_4 = arith.constant 0 : index
    %9 = vector.load %arg2[%c0, %c0_4] : memref<512x128xf32, #tpu.memory_space<vmem>>, vector<512x128xf32>
    %c0_5 = arith.constant 0 : index
    %c0_6 = arith.constant 0 : index
    %10 = vector.load %arg3[%c0_5, %c0_6] : memref<512x128xf32, #tpu.memory_space<vmem>>, vector<512x128xf32>
    %11 = arith.subf %9, %10 : vector<512x128xf32>
    %c0_7 = arith.constant 0 : index
    %c0_8 = arith.constant 0 : index
    %12 = vector.load %arg4[%c0_7, %c0_8] : memref<512x128xf32, #tpu.memory_space<vmem>>, vector<512x128xf32>
    %13 = arith.mulf %11, %11 : vector<512x128xf32>
    %14 = vector.broadcast %8 : f32 to vector<512x128xf32>
    %15 = arith.mulf %14, %13 : vector<512x128xf32>
    %16 = arith.addf %12, %15 : vector<512x128xf32>
    %c0_9 = arith.constant 0 : index
    %c0_10 = arith.constant 0 : index
    %17 = vector.load %arg4[%c0_9, %c0_10] : memref<512x128xf32, #tpu.memory_space<vmem>>, vector<512x128xf32>
    tpu.vector_store %arg4[%c0_9, %c0_10], %16 {strides = array<i32>} : memref<512x128xf32, #tpu.memory_space<vmem>>, vector<512x128xf32>,
    return
  }
  func.func @transform_0(%arg0: i32, %arg1: i32) -> (i32, i32) {
    %c2_i32 = arith.constant 2 : i32
    %0 = arith.muli %arg0, %c2_i32 : i32
    %1 = arith.addi %0, %arg1 : i32
    %c0_i32 = arith.constant 0 : i32
    %c0_i32_0 = arith.constant 0 : i32
    return %1, %c0_i32 : i32, i32
  }
  func.func @transform_1(%arg0: i32, %arg1: i32) -> (i32, i32) {
    %c2_i32 = arith.constant 2 : i32
    %0 = arith.muli %arg0, %c2_i32 : i32
    %1 = arith.addi %0, %arg1 : i32
    %c0_i32 = arith.constant 0 : i32
    %c0_i32_0 = arith.constant 0 : i32
    return %1, %c0_i32 : i32, i32
  }
  func.func @transform_2(%arg0: i32, %arg1: i32) -> (i32, i32) {
    %c0_i32 = arith.constant 0 : i32
    %c0_i32_0 = arith.constant 0 : i32
    return %arg0, %c0_i32 : i32, i32
  }
}

</mosaic_0001>

<bundles_post_ra>
// kernel: tpu_custom_call.1
= control target key start
LH: loop header
LB: loop body
LE: loop exit
PB: predicated region body
PF: predicated region fallthrough
CT: control target
= control target key end

     0   :  { %s2049_s0 = inlined_call_operand.hbm [shape: f32[2048,128], index: 0, kind: input, shape index: {}]   ;;  %s2050_s1 = inlined_call_operand.hbm [shape: f32[2048,128], index: 1, kind: input, shape index: {}]   ;;  %s2051_s2 = inlined_call_operand.hbm [shape: f32[1024,128], index: 2, kind: output, shape index: {}]  }
   0x1   :  { %2060 = sst [smem:[#allocation15_spill]] %s2049_s0 }
   0x2   :  { %7 = vsyncpa [#allocation3], 0 }
   0x3   :  { %9 = vsyncpa [#allocation3 + $0x1], 0 }
   0x4   :  { %10 = vsyncpa [#allocation6], 0 }
   0x5   :  { %12 = vsyncpa [#allocation6 + $0x1], 0 }
   0x6   :  { %13 = vsyncpa [#allocation4], 0 }
   0x7   :  { %15 = vsyncpa [#allocation4 + $0x1], 0  ;;  %s1298_s9 = smov 0   ;;  %s1300_s10 = smov 0  }
   0x8   :  { %s1302_s11 = smov 0   ;;  %s1304_s12 = smov 0  }
   0x9   :  { %s1306_s13 = smov 0   ;;  %s1308_s14 = smov 0  }
   0xa   :  { %s1310_s15 = smov 0   ;;  %s1312_s16 = smov 0  }
   0xb   :  { %s1314_s17 = smov 0   ;;  %s1316_s18 = smov 0  }
   0xc   :  { %s1318_s19 = smov 0  }
   0xd LB: > { %2061 = sst [smem:[#allocation11_spill]] %s1265_s17  ;;  %s945_s20 = sadd.s32 4294967295, %s1273_s19   ;;  %s1273_s19 = sphi %s1318_s19, %s21_s19   ;;  %s1269_s18 = sphi %s1316_s18, %s2081_s18   ;;  %s1265_s17 = sphi %s1314_s17, %s2080_s17   ;;  %s1261_s16 = sphi %s1312_s16, %s2079_s16   ;;  %s1257_s15 = sphi %s1310_s15, %s2078_s15   ;;  %s1253_s14 = sphi %s1308_s14, %s2087_s14   ;;  %s1249_s13 = sphi %s1306_s13, %s2086_s13   ;;  %s1245_s12 = sphi %s1304_s12, %s2085_s12   ;;  %s1241_s11 = sphi %s1302_s11, %s2084_s11   ;;  %s1237_s10 = sphi %s1300_s10, %s2083_s10   ;;  %s1233_s9 = sphi %s1298_s9, %s2082_s9  }
   0xe   : > { %2062 = sst [smem:[#allocation12_spill]] %s1269_s18  ;;  %s946_s21 = sadd.s32 4294967294, %s1273_s19  }
   0xf   : > { %s30_s22 = sadd.s32 1, %s1265_s17  ;;  %s33_s23 = sadd.s32 1, %s1269_s18 }
  0x10   : > { %p31_p0 = scmp.ge.s32.totalorder %s30_s22, 2  ;;  %s947_s24 = sshll.u32 %s1269_s18, 1 }
  0x11   : > { %s1357_s25 = sadd.s32 %s1265_s17, %s947_s24  ;;  %s44_s26 = sadd.s32 1, %s1253_s14 }
  0x12   : > { %s2089_s22 = smov (%p31_p0, %s30_s22), 0  ;;  %s2091_s23 = smov (!%p31_p0, %s33_s23), %s1269_s18 }
  0x13   : > { %2063 = sst [smem:[#allocation13_spill]] %s2089_s22  ;;  %p51_p1 = scmp.ne.s32.totalorder %s1253_s14, %s1249_s13 }
  0x14   : > { %p52_p2 = scmp.eq.s32.totalorder %s1273_s19, 0  ;;  %p35_p3 = scmp.ge.s32.totalorder %s2091_s23, 2 }
  0x15   : > { %p57_p4 = scmp.ne.s32.totalorder %s1249_s13, %s1245_s12  ;;  %p58_p6 = scmp.eq.s32.totalorder %s945_s20, 0 }
  0x16   : > { %p1367_p5 = por %p52_p2, %p51_p1  ;;  %s2093_s23 = smov (%p35_p3, %s2091_s23), 0 }
  0x17   : > { %2065 = sst [smem:[#allocation14_spill]] %s2093_s23  ;;  %p1373_p7 = por %p58_p6, %p57_p4 }
  0x18   : > { %s100_s29 = sadd.s32 1, %s1241_s11  ;;  %s948_s30 = sshll.u32 %s2093_s23, 1 }
  0x19   : > { %s2066_s28 = scalar_select %p1373_p7, 1, 0 }
  0x1a   : > { %s97_s3 = ssub.s32 %s1269_s18, %s2093_s23  ;;  %s40_s4 = sadd.s32 %s948_s30, %s2089_s22 }
  0x1b   : > { %p98_p8 = scmp.eq.s32.totalorder %s97_s3, 0  ;;  %s41_s5 = ssub.s32 %s1357_s25, %s40_s4 }
  0x1c   : > { %p110_p9 = scmp.ne.s32.totalorder %s1241_s11, %s1237_s10  ;;  %p42_p10 = scmp.eq.s32.totalorder %s41_s5, 0 }
  0x1d   : > { %p111_p11 = scmp.eq.s32.totalorder %s945_s20, 3  ;;  %p116_p13 = scmp.ne.s32.totalorder %s1237_s10, %s1233_s9 }
  0x1e   : > { %s1386_s6 = scalar_select %p98_p8, %s1241_s11, %s100_s29  }
  0x1f   : > { %s1389_s7 = scalar_select %p42_p10, %s1253_s14, %s44_s26  }
  0x20   : > { %p1391_p12 = por %p111_p11, %p110_p9  ;;  %p117_p0 = scmp.eq.s32.totalorder %s946_s21, 3 }
  0x21   : > { %p992_p1 = scmp.lt.s32.totalorder %s1273_s19, 4  ;;  %s1401_s12 = sand.u32 1, %s1253_s14  }
  0x22   : > { %s2067_s8 = scalar_select %p1391_p12, 1, 0 }
  0x23   : > { %p1403_p2 = por %p117_p0, %p116_p13  ;;  %s2053_s20 = sshll.u32 %s1401_s12, 9 }
  0x24   : > { %s2054_s26 = sshll.u32 %s1357_s25, 13  ;;  %s2069_s0 = sld [smem:[#allocation15_spill]] }
  0x25   : > { %s2068_s24 = scalar_select %p1403_p2, 1, 0 }
  0x26   : > { %s141_s21 = scalar_lea.vmem [#allocation2], %s2053_s20  ;;  %p1420_p3 = pnand %p992_p1, %p1367_p5 }
  0x27   : > { %s150_s4 = sshll.u32 %s141_s21, 4  ;;  %s1424_s4 = int_to_ptr.vmem [resolvable:$true] %s150_s4 }
  0x28   : > { %p1089_p6 = pneg %p1420_p3 }
  0x2a   : > { %s1414_s3 = scalar_lea.hbm %s2069_s0, %s2054_s26  ;;  %s1092_s27 = scalar_lea.hbm %s2069_s0, 32768 }
  0x2b   : > { %s1087_s29 = scalar_lea.hbm %s1414_s3, 8192  ;;  %p1093_p5 = scmp.lt.u32.totalorder %s1414_s3, %s2069_s0 }
  0x2c   : > { %p1088_p4 = scmp.ne.s32.totalorder %s1414_s3, %s1087_s29  ;;  %p1094_p10 = scmp.lt.u32.totalorder %s1092_s27, %s1087_s29 }
  0x2d   : > { %p1096_p13 = scmp.lt.u32.totalorder %s1087_s29, %s1414_s3 }
  0x2e   : > { %p1090_p8 = pnand %p1089_p6, %p1088_p4  ;;  %p1095_p11 = por %p1094_p10, %p1093_p5 }
  0x30   : > { %p1091_p9 = pneg %p1090_p8  ;;  %p1097_p0 = por %p1096_p13, %p1095_p11 }
  0x32   : > { %p1098_p1 = pnand %p1097_p0, %p1091_p9 }
  0x34   : > { %1101 = shalt.err (!%p1098_p1)
}
  0x35   : > { %s1102_s23 = scalar_lea.vmem %s1424_s4, 8192  ;;  %s1275_s30 = smov [#allocation2]  }
  0x36   : > { %p1103_p4 = scmp.ne.s32.totalorder %s1424_s4, %s1102_s23  ;;  %s1107_s21 = sshll.u32 %s1275_s30, 4  ;;  %s1108_s21 = int_to_ptr.vmem [resolvable:$false] %s1107_s21 }
  0x37   : > { %s1109_s20 = scalar_lea.vmem %s1108_s21, 16384  ;;  %p1110_p12 = scmp.lt.s32.totalorder %s1424_s4, %s1108_s21 }
  0x38   : > { %p1105_p8 = pnand %p1103_p4, %p1089_p6  ;;  %p1111_p5 = scmp.lt.s32.totalorder %s1109_s20, %s1102_s23 }
  0x3a   : > { %p1106_p2 = pneg %p1105_p8  ;;  %p1112_p10 = por %p1111_p5, %p1110_p12 }
  0x3c   : > { %p1113_p11 = pnand %p1112_p10, %p1106_p2 }
  0x3e   : > { %1116 = shalt.err (!%p1113_p11)
}
  0x3f   : > { %s1276_s26 = smov 128   ;;  %s1277_s29 = smov 8  }
  0x40   : > { %s2071_s23 = scalar_lea.sflag [#allocation3], %s1401_s12  ;;  %p961_p12 = scmp.ge.s32.totalorder %s1273_s19, 1 }
  0x41   : > { %984 = dma.hbm_to_vmem [thread:$0]  (!%p1420_p3), %s1414_s3, 8192, %s1424_s4, %s2071_s23, %s1276_s26, %s1276_s26, %s1277_s29  }
  0x42   : > { %p181_p2 = scmp.lt.s32.totalorder %s1273_s19, 5  ;;  %s2073_s30 = sshll.u32 %s1357_s25, 13 }
  0x43   : > { %s1468_s0 = scalar_lea.hbm %s2050_s1, %s2073_s30  ;;  %s2074_s22 = sshll.u32 %s1401_s12, 9 }
  0x44   : > { %p1459_p9 = pnand %p961_p12, %p181_p2  ;;  %s164_s18 = scalar_lea.vmem [#allocation5], %s2074_s22 }
  0x45   : > { %s173_s17 = sshll.u32 %s164_s18, 4  ;;  %s161_s3 = scalar_lea.sflag [#allocation6], %s1401_s12  ;;  %s1472_s17 = int_to_ptr.vmem [resolvable:$true] %s173_s17 }
  0x46   : > { %s1117_s4 = scalar_lea.hbm %s1468_s0, 8192  ;;  %s1122_s30 = scalar_lea.hbm %s2050_s1, 32768 }
  0x47   : > { %p1118_p13 = scmp.ne.s32.totalorder %s1468_s0, %s1117_s4  ;;  %p1123_p4 = scmp.lt.u32.totalorder %s1468_s0, %s2050_s1 }
  0x48   : > { %p1124_p8 = scmp.lt.u32.totalorder %s1122_s30, %s1117_s4  ;;  %p1126_p10 = scmp.lt.u32.totalorder %s1117_s4, %s1468_s0 }
  0x49   : > { %p1120_p0 = pnand %p1118_p13, %p1089_p6 }
  0x4a   : > { %p1125_p5 = por %p1124_p8, %p1123_p4 }
  0x4b   : > { %p1121_p1 = pneg %p1120_p0 }
  0x4c   : > { %p1127_p11 = por %p1126_p10, %p1125_p5 }
  0x4e   : > { %p1128_p12 = pnand %p1127_p11, %p1121_p1 }
  0x50   : > { %1131 = shalt.err (!%p1128_p12)
}
  0x51   : > { %s1132_s18 = scalar_lea.vmem %s1472_s17, 8192  ;;  %s1278_s22 = smov [#allocation5]  }
  0x52   : > { %p1133_p2 = scmp.ne.s32.totalorder %s1472_s17, %s1132_s18  ;;  %s1137_s25 = sshll.u32 %s1278_s22, 4  ;;  %s1138_s25 = int_to_ptr.vmem [resolvable:$false] %s1137_s25 }
  0x53   : > { %s1139_s23 = scalar_lea.vmem %s1138_s25, 16384  ;;  %p1140_p7 = scmp.lt.s32.totalorder %s1472_s17, %s1138_s25 }
  0x54   : > { %p1135_p13 = pnand %p1133_p2, %p1089_p6  ;;  %p1141_p4 = scmp.lt.s32.totalorder %s1139_s23, %s1132_s18 }
  0x56   : > { %p1136_p0 = pneg %p1135_p13  ;;  %p1142_p8 = por %p1141_p4, %p1140_p7 }
  0x58   : > { %p1143_p5 = pnand %p1142_p8, %p1136_p0 }
  0x5a   : > { %1146 = shalt.err (!%p1143_p5)
}
  0x5b   : > { %987 = dma.hbm_to_vmem [thread:$0]  (!%p1420_p3), %s1468_s0, 8192, %s1472_s17, %s161_s3, %s1276_s26, %s1276_s26, %s1277_s29  }
  0x5c   : > { %185 = sbr.rel (%p1459_p9) target bundleno = 230 (0xe6), region = 28  ;;  %s187_s4 = sand.u32 (!%p1459_p9), 1, %s1249_s13  }
  0x5d   : > { %s962_s30 = sshll.u32 (!%p1459_p9), %s187_s4, 9  ;;  %s188_s21 = scalar_lea.sflag (!%p1459_p9), [#allocation3], %s187_s4 }
  0x5e   : > { %s1506_s20 = scalar_lea.vmem (!%p1459_p9), [#allocation2], %s962_s30  ;;  %p2075_p7 = scmp.ne.s32.totalorder (!%p1459_p9), %s2066_s28, 0 }
  0x63   : > { %1220 = dma.done.wait (%p2075_p7), %s188_s21, 8192  }
  0x64   : > { %1222 = vsyncadd (%p2075_p7), %s188_s21, 4294959104  ;;  %s197_s12 = scalar_lea.sflag [#allocation6], %s187_s4  ;;  %s1512_s5 = scalar_lea.vmem [#allocation5], %s962_s30 }
  0x65   : > { %1224 = dma.done.wait (%p2075_p7), %s197_s12, 8192  }
  0x66   : > { %1226 = vsyncadd (%p2075_p7), %s197_s12, 4294959104  ;;  %s223_s0 = sand.u32 1, %s1237_s10   ;;  %p965_p3 = scmp.ne.s32.totalorder %s1257_s15, 0 }
  0x67   : > { %s964_s17 = sshll.u32 %s223_s0, 9  ;;  %v1279_v0 = vmov (!%p965_p3), 0.0  }
  0x68   : > { %s1521_s26 = scalar_lea.vmem [#allocation7], %s964_s17  ;;  %236 = sbr.rel (%p965_p3) target bundleno = 137 (0x89), region = 40 }
  0x69   : > { %237 = vst [vmem:[%s1521_s26] sm:$0xff] (!%p965_p3), %v1279_v0  ;;  %238 = vst [vmem:[%s1521_s26 + $0x8] sm:$0xff] (!%p965_p3), %v1279_v0 }
  0x6a   : > { %239 = vst [vmem:[%s1521_s26 + $0x10] sm:$0xff] (!%p965_p3), %v1279_v0  ;;  %240 = vst [vmem:[%s1521_s26 + $0x18] sm:$0xff] (!%p965_p3), %v1279_v0 }
  0x6b   : > { %241 = vst [vmem:[%s1521_s26 + $0x20] sm:$0xff] (!%p965_p3), %v1279_v0  ;;  %242 = vst [vmem:[%s1521_s26 + $0x28] sm:$0xff] (!%p965_p3), %v1279_v0 }
  0x6c   : > { %243 = vst [vmem:[%s1521_s26 + $0x30] sm:$0xff] (!%p965_p3), %v1279_v0  ;;  %244 = vst [vmem:[%s1521_s26 + $0x38] sm:$0xff] (!%p965_p3), %v1279_v0 }
  0x6d   : > { %245 = vst [vmem:[%s1521_s26 + $0x40] sm:$0xff] (!%p965_p3), %v1279_v0  ;;  %246 = vst [vmem:[%s1521_s26 + $0x48] sm:$0xff] (!%p965_p3), %v1279_v0 }
  0x6e   : > { %247 = vst [vmem:[%s1521_s26 + $0x50] sm:$0xff] (!%p965_p3), %v1279_v0  ;;  %248 = vst [vmem:[%s1521_s26 + $0x58] sm:$0xff] (!%p965_p3), %v1279_v0 }
  0x6f   : > { %249 = vst [vmem:[%s1521_s26 + $0x60] sm:$0xff] %v1279_v0  ;;  %250 = vst [vmem:[%s1521_s26 + $0x68] sm:$0xff] %v1279_v0 }
  0x70   : > { %251 = vst [vmem:[%s1521_s26 + $0x70] sm:$0xff] %v1279_v0  ;;  %252 = vst [vmem:[%s1521_s26 + $0x78] sm:$0xff] %v1279_v0 }
  0x71   : > { %253 = vst [vmem:[%s1521_s26 + $0x80] sm:$0xff] %v1279_v0  ;;  %254 = vst [vmem:[%s1521_s26 + $0x88] sm:$0xff] %v1279_v0 }
  0x72   : > { %255 = vst [vmem:[%s1521_s26 + $0x90] sm:$0xff] %v1279_v0  ;;  %256 = vst [vmem:[%s1521_s26 + $0x98] sm:$0xff] %v1279_v0 }
  0x73   : > { %257 = vst [vmem:[%s1521_s26 + $0xa0] sm:$0xff] %v1279_v0  ;;  %258 = vst [vmem:[%s1521_s26 + $0xa8] sm:$0xff] %v1279_v0 }
  0x74   : > { %259 = vst [vmem:[%s1521_s26 + $0xb0] sm:$0xff] %v1279_v0  ;;  %260 = vst [vmem:[%s1521_s26 + $0xb8] sm:$0xff] %v1279_v0 }
  0x75   : > { %261 = vst [vmem:[%s1521_s26 + $0xc0] sm:$0xff] %v1279_v0  ;;  %262 = vst [vmem:[%s1521_s26 + $0xc8] sm:$0xff] %v1279_v0 }
  0x76   : > { %263 = vst [vmem:[%s1521_s26 + $0xd0] sm:$0xff] %v1279_v0  ;;  %264 = vst [vmem:[%s1521_s26 + $0xd8] sm:$0xff] %v1279_v0 }
  0x77   : > { %265 = vst [vmem:[%s1521_s26 + $0xe0] sm:$0xff] %v1279_v0  ;;  %266 = vst [vmem:[%s1521_s26 + $0xe8] sm:$0xff] %v1279_v0 }
  0x78   : > { %267 = vst [vmem:[%s1521_s26 + $0xf0] sm:$0xff] %v1279_v0  ;;  %268 = vst [vmem:[%s1521_s26 + $0xf8] sm:$0xff] %v1279_v0 }
  0x79   : > { %269 = vst [vmem:[%s1521_s26 + $0x100] sm:$0xff] %v1279_v0  ;;  %270 = vst [vmem:[%s1521_s26 + $0x108] sm:$0xff] %v1279_v0 }
  0x7a   : > { %271 = vst [vmem:[%s1521_s26 + $0x110] sm:$0xff] %v1279_v0  ;;  %272 = vst [vmem:[%s1521_s26 + $0x118] sm:$0xff] %v1279_v0 }
  0x7b   : > { %273 = vst [vmem:[%s1521_s26 + $0x120] sm:$0xff] %v1279_v0  ;;  %274 = vst [vmem:[%s1521_s26 + $0x128] sm:$0xff] %v1279_v0 }
  0x7c   : > { %275 = vst [vmem:[%s1521_s26 + $0x130] sm:$0xff] %v1279_v0  ;;  %276 = vst [vmem:[%s1521_s26 + $0x138] sm:$0xff] %v1279_v0 }
  0x7d   : > { %277 = vst [vmem:[%s1521_s26 + $0x140] sm:$0xff] %v1279_v0  ;;  %278 = vst [vmem:[%s1521_s26 + $0x148] sm:$0xff] %v1279_v0 }
  0x7e   : > { %279 = vst [vmem:[%s1521_s26 + $0x150] sm:$0xff] %v1279_v0  ;;  %280 = vst [vmem:[%s1521_s26 + $0x158] sm:$0xff] %v1279_v0 }
  0x7f   : > { %281 = vst [vmem:[%s1521_s26 + $0x160] sm:$0xff] %v1279_v0  ;;  %282 = vst [vmem:[%s1521_s26 + $0x168] sm:$0xff] %v1279_v0 }
  0x80   : > { %283 = vst [vmem:[%s1521_s26 + $0x170] sm:$0xff] %v1279_v0  ;;  %284 = vst [vmem:[%s1521_s26 + $0x178] sm:$0xff] %v1279_v0 }
  0x81   : > { %285 = vst [vmem:[%s1521_s26 + $0x180] sm:$0xff] %v1279_v0  ;;  %286 = vst [vmem:[%s1521_s26 + $0x188] sm:$0xff] %v1279_v0 }
  0x82   : > { %287 = vst [vmem:[%s1521_s26 + $0x190] sm:$0xff] %v1279_v0  ;;  %288 = vst [vmem:[%s1521_s26 + $0x198] sm:$0xff] %v1279_v0 }
  0x83   : > { %289 = vst [vmem:[%s1521_s26 + $0x1a0] sm:$0xff] %v1279_v0  ;;  %290 = vst [vmem:[%s1521_s26 + $0x1a8] sm:$0xff] %v1279_v0 }
  0x84   : > { %291 = vst [vmem:[%s1521_s26 + $0x1b0] sm:$0xff] %v1279_v0  ;;  %292 = vst [vmem:[%s1521_s26 + $0x1b8] sm:$0xff] %v1279_v0 }
  0x85   : > { %293 = vst [vmem:[%s1521_s26 + $0x1c0] sm:$0xff] %v1279_v0  ;;  %294 = vst [vmem:[%s1521_s26 + $0x1c8] sm:$0xff] %v1279_v0 }
  0x86   : > { %295 = vst [vmem:[%s1521_s26 + $0x1d0] sm:$0xff] %v1279_v0  ;;  %296 = vst [vmem:[%s1521_s26 + $0x1d8] sm:$0xff] %v1279_v0 }
  0x87   : > { %297 = vst [vmem:[%s1521_s26 + $0x1e0] sm:$0xff] %v1279_v0  ;;  %298 = vst [vmem:[%s1521_s26 + $0x1e8] sm:$0xff] %v1279_v0 }
  0x88   : > { %299 = vst [vmem:[%s1521_s26 + $0x1f0] sm:$0xff] %v1279_v0  ;;  %300 = vst [vmem:[%s1521_s26 + $0x1f8] sm:$0xff] %v1279_v0 }
  0x89 PF: > { %s966_s28 = sshll.u32 %s1261_s16, 1  ;;  %v307_v1 = vld [vmem:[%s1506_s20] sm:$0xff]  ;;  %v308_v4 = vld [vmem:[%s1506_s20 + $0x8] sm:$0xff]  ;;  %v309_v7 = vld [vmem:[%s1506_s20 + $0x10] sm:$0xff]  ;;  %s834_s3 = sshll.u32 %s1521_s26, 4  ;;  %s1980_s3 = int_to_ptr.vmem [resolvable:$true] %s834_s3 }
  0x8a   : > { %v371_v2 = vld [vmem:[%s1512_s5] sm:$0xff]  ;;  %s302_s29 = sadd.s32 %s1257_s15, %s966_s28  ;;  %v372_v5 = vld [vmem:[%s1512_s5 + $0x8] sm:$0xff]  ;;  %v373_v8 = vld [vmem:[%s1512_s5 + $0x10] sm:$0xff]  ;;  %s974_s15 = sshll.u32 %s1261_s16, 13 }
  0x8b   : > { %v435_v3 = vsub.f32 %v307_v1, %v371_v2  ;;  %p303_p6 = scmp.lt.s32.totalorder %s302_s29, 2  ;;  %p305_p9 = scmp.lt.s32.totalorder %s302_s29, 1  ;;  %v436_v6 = vsub.f32 %v308_v4, %v372_v5  ;;  %v437_v9 = vsub.f32 %v309_v7, %v373_v8  ;;  %v310_v10 = vld [vmem:[%s1506_s20 + $0x18] sm:$0xff]  ;;  %v311_v13 = vld [vmem:[%s1506_s20 + $0x20] sm:$0xff]  ;;  %v312_v19 = vld [vmem:[%s1506_s20 + $0x28] sm:$0xff] }
  0x8c   : > { %v374_v11 = vld [vmem:[%s1512_s5 + $0x18] sm:$0xff]  ;;  %v375_v14 = vld [vmem:[%s1512_s5 + $0x20] sm:$0xff]  ;;  %v376_v20 = vld [vmem:[%s1512_s5 + $0x28] sm:$0xff]  ;;  %s1978_s22 = scalar_lea.hbm %s2051_s2, %s974_s15  ;;  %s1988_s25 = scalar_lea.sflag [#allocation4], %s223_s0 }
  0x8d   : > { %s304_s27 = scalar_select %p303_p6, 0.0015625, 0.041666668  ;;  %v438_v12 = vsub.f32 %v310_v10, %v374_v11  ;;  %v563_v15 = vmul.f32 %v435_v3, %v435_v3  ;;  %v564_v16 = vmul.f32 %v436_v6, %v436_v6  ;;  %v565_v17 = vmul.f32 %v437_v9, %v437_v9  ;;  %v499_v21 = vld [vmem:[%s1521_s26] sm:$0xff]  ;;  %v500_v22 = vld [vmem:[%s1521_s26 + $0x8] sm:$0xff] }
  0x8e   : > { %v439_v18 = vsub.f32 %v311_v13, %v375_v14  ;;  %v440_v24 = vsub.f32 %v312_v19, %v376_v20  ;;  %v313_v25 = vld [vmem:[%s1506_s20 + $0x30] sm:$0xff]  ;;  %v314_v30 = vld [vmem:[%s1506_s20 + $0x38] sm:$0xff]  ;;  %v503_v34 = vld [vmem:[%s1521_s26 + $0x20] sm:$0xff]  ;;  %s1147_s23 = scalar_lea.vmem %s1980_s3, 8192  ;;  %p2076_p10 = scmp.ne.s32.totalorder %s2067_s8, 0 }
  0x8f   : > { %s2095_s27 = smov (%p305_p9, %s304_s27), 0.015625  ;;  %v566_v23 = vmul.f32 %v438_v12, %v438_v12  ;;  %v377_v26 = vld [vmem:[%s1512_s5 + $0x30] sm:$0xff]  ;;  %v378_v31 = vld [vmem:[%s1512_s5 + $0x38] sm:$0xff]  ;;  %v504_v35 = vld [vmem:[%s1521_s26 + $0x28] sm:$0xff]  ;;  %p1148_p1 = scmp.ne.s32.totalorder %s1980_s3, %s1147_s23 }
  0x90   : > { %v501_v27 = vld [vmem:[%s1521_s26 + $0x10] sm:$0xff]  ;;  %v567_v28 = vmul.f32 %v439_v18, %v439_v18  ;;  %v441_v29 = vsub.f32 %v313_v25, %v377_v26  ;;  %v1674_v32 = vstv %s2095_s27  ;;  %v502_v33 = vld [vmem:[%s1521_s26 + $0x18] sm:$0xff]  ;;  %v568_v36 = vmul.f32 %v440_v24, %v440_v24  ;;  %v315_v43 = vld [vmem:[%s1506_s20 + $0x40] sm:$0xff]  ;;  %s1280_s4 = smov [#allocation7]  }
  0x91   : > { %v442_v37 = vsub.f32 %v314_v30, %v378_v31  ;;  %v628_v38 = vmul.f32 %v1674_v32, %v563_v15  ;;  %v629_v39 = vmul.f32 %v1674_v32, %v564_v16  ;;  %v630_v40 = vmul.f32 %v1674_v32, %v565_v17  ;;  %v505_v42 = vld [vmem:[%s1521_s26 + $0x30] sm:$0xff]  ;;  %v379_v44 = vld [vmem:[%s1512_s5 + $0x40] sm:$0xff]  ;;  %v316_v45 = vld [vmem:[%s1506_s20 + $0x48] sm:$0xff]  ;;  %p1149_p11 = pnand %p1148_p1, %p2076_p10  ;;  %s1151_s30 = sshll.u32 %s1280_s4, 4  ;;  %s1152_s30 = int_to_ptr.vmem [resolvable:$false] %s1151_s30 }
  0x92   : > { %v631_v41 = vmul.f32 %v1674_v32, %v566_v23  ;;  %v632_v46 = vmul.f32 %v1674_v32, %v567_v28  ;;  %v633_v47 = vmul.f32 %v1674_v32, %v568_v36  ;;  %v569_v48 = vmul.f32 %v441_v29, %v441_v29  ;;  %v380_v50 = vld [vmem:[%s1512_s5 + $0x48] sm:$0xff]  ;;  %v317_v51 = vld [vmem:[%s1506_s20 + $0x50] sm:$0xff]  ;;  %v506_v57 = vld [vmem:[%s1521_s26 + $0x38] sm:$0xff]  ;;  %s1153_s21 = scalar_lea.vmem %s1152_s30, 16384  ;;  %p1154_p2 = scmp.lt.s32.totalorder %s1980_s3, %s1152_s30 }
  0x93   : > { %v570_v49 = vmul.f32 %v442_v37, %v442_v37  ;;  %v381_v52 = vld [vmem:[%s1512_s5 + $0x50] sm:$0xff]  ;;  %v692_v53 = vadd.f32 %v628_v38, %v499_v21  ;;  %v693_v54 = vadd.f32 %v629_v39, %v500_v22  ;;  %v694_v55 = vadd.f32 %v630_v40, %v501_v27  ;;  %v318_v58 = vld [vmem:[%s1506_s20 + $0x58] sm:$0xff]  ;;  %v319_v0 = vld [vmem:[%s1506_s20 + $0x60] sm:$0xff]  ;;  %p1150_p12 = pneg %p1149_p11  ;;  %p1155_p13 = scmp.lt.s32.totalorder %s1153_s21, %s1147_s23 }
  0x94   : > { %v695_v56 = vadd.f32 %v631_v41, %v502_v33  ;;  %v382_v59 = vld [vmem:[%s1512_s5 + $0x58] sm:$0xff]  ;;  %v696_v60 = vadd.f32 %v632_v46, %v503_v34  ;;  %v697_v61 = vadd.f32 %v633_v47, %v504_v35  ;;  %v634_v62 = vmul.f32 %v1674_v32, %v569_v48  ;;  %v383_v1 = vld [vmem:[%s1512_s5 + $0x60] sm:$0xff]  ;;  %v320_v6 = vld [vmem:[%s1506_s20 + $0x68] sm:$0xff] }
  0x95   : > { %v635_v63 = vmul.f32 %v1674_v32, %v570_v49  ;;  %756 = vst [vmem:[%s1521_s26] sm:$0xff] %v692_v53  ;;  %757 = vst [vmem:[%s1521_s26 + $0x8] sm:$0xff] %v693_v54  ;;  %v443_v2 = vsub.f32 %v315_v43, %v379_v44  ;;  %v444_v3 = vsub.f32 %v316_v45, %v380_v50  ;;  %v384_v7 = vld [vmem:[%s1512_s5 + $0x68] sm:$0xff]  ;;  %v507_v10 = vld [vmem:[%s1521_s26 + $0x40] sm:$0xff]  ;;  %p1156_p0 = por %p1155_p13, %p1154_p2 }
  0x96   : > { %758 = vst [vmem:[%s1521_s26 + $0x10] sm:$0xff] %v694_v55  ;;  %759 = vst [vmem:[%s1521_s26 + $0x18] sm:$0xff] %v695_v56  ;;  %v445_v4 = vsub.f32 %v317_v51, %v381_v52  ;;  %v446_v5 = vsub.f32 %v318_v58, %v382_v59  ;;  %v698_v8 = vadd.f32 %v634_v62, %v505_v42  ;;  %v508_v11 = vld [vmem:[%s1521_s26 + $0x48] sm:$0xff]  ;;  %v321_v14 = vld [vmem:[%s1506_s20 + $0x70] sm:$0xff] }
  0x97   : > { %760 = vst [vmem:[%s1521_s26 + $0x20] sm:$0xff] %v696_v60  ;;  %761 = vst [vmem:[%s1521_s26 + $0x28] sm:$0xff] %v697_v61  ;;  %v699_v9 = vadd.f32 %v635_v63, %v506_v57  ;;  %v447_v12 = vsub.f32 %v319_v0, %v383_v1  ;;  %v448_v13 = vsub.f32 %v320_v6, %v384_v7  ;;  %v385_v15 = vld [vmem:[%s1512_s5 + $0x70] sm:$0xff]  ;;  %v322_v21 = vld [vmem:[%s1506_s20 + $0x78] sm:$0xff]  ;;  %p1157_p4 = pnand %p1156_p0, %p1150_p12 }
  0x98   : > { %v571_v16 = vmul.f32 %v443_v2, %v443_v2  ;;  %v572_v17 = vmul.f32 %v444_v3, %v444_v3  ;;  %v509_v18 = vld [vmem:[%s1521_s26 + $0x50] sm:$0xff]  ;;  %v573_v19 = vmul.f32 %v445_v4, %v445_v4  ;;  %v574_v20 = vmul.f32 %v446_v5, %v446_v5  ;;  %v386_v22 = vld [vmem:[%s1512_s5 + $0x78] sm:$0xff]  ;;  %762 = vst [vmem:[%s1521_s26 + $0x30] sm:$0xff] %v698_v8  ;;  %v511_v24 = vld [vmem:[%s1521_s26 + $0x60] sm:$0xff] }
  0x99   : > { %763 = vst [vmem:[%s1521_s26 + $0x38] sm:$0xff] %v699_v9  ;;  %v510_v23 = vld [vmem:[%s1521_s26 + $0x58] sm:$0xff]  ;;  %v575_v25 = vmul.f32 %v447_v12, %v447_v12  ;;  %v512_v26 = vld [vmem:[%s1521_s26 + $0x68] sm:$0xff]  ;;  %v576_v27 = vmul.f32 %v448_v13, %v448_v13  ;;  %v449_v28 = vsub.f32 %v321_v14, %v385_v15  ;;  %v450_v29 = vsub.f32 %v322_v21, %v386_v22  ;;  %v513_v35 = vld [vmem:[%s1521_s26 + $0x70] sm:$0xff] }
  0x9a   : > { %v636_v30 = vmul.f32 %v1674_v32, %v571_v16  ;;  %v637_v31 = vmul.f32 %v1674_v32, %v572_v17  ;;  %v638_v33 = vmul.f32 %v1674_v32, %v573_v19  ;;  %v639_v34 = vmul.f32 %v1674_v32, %v574_v20  ;;  %v323_v36 = vld [vmem:[%s1506_s20 + $0x80] sm:$0xff]  ;;  %v324_v38 = vld [vmem:[%s1506_s20 + $0x88] sm:$0xff]  ;;  %v325_v44 = vld [vmem:[%s1506_s20 + $0x90] sm:$0xff] }
  0x9b   : > { %v387_v37 = vld [vmem:[%s1512_s5 + $0x80] sm:$0xff]  ;;  %v640_v39 = vmul.f32 %v1674_v32, %v575_v25  ;;  %v641_v40 = vmul.f32 %v1674_v32, %v576_v27  ;;  %v577_v41 = vmul.f32 %v449_v28, %v449_v28  ;;  %v578_v42 = vmul.f32 %v450_v29, %v450_v29  ;;  %v388_v43 = vld [vmem:[%s1512_s5 + $0x88] sm:$0xff]  ;;  %v389_v45 = vld [vmem:[%s1512_s5 + $0x90] sm:$0xff] }
  0x9c   : > { %v700_v46 = vadd.f32 %v636_v30, %v507_v10  ;;  %v701_v47 = vadd.f32 %v637_v31, %v508_v11  ;;  %v702_v48 = vadd.f32 %v638_v33, %v509_v18  ;;  %v703_v49 = vadd.f32 %v639_v34, %v510_v23  ;;  %v514_v50 = vld [vmem:[%s1521_s26 + $0x78] sm:$0xff]  ;;  %v327_v57 = vld [vmem:[%s1506_s20 + $0xa0] sm:$0xff]  ;;  %v328_v63 = vld [vmem:[%s1506_s20 + $0xa8] sm:$0xff] }
  0x9d   : > { %v326_v51 = vld [vmem:[%s1506_s20 + $0x98] sm:$0xff]  ;;  %v704_v53 = vadd.f32 %v640_v39, %v511_v24  ;;  %v705_v54 = vadd.f32 %v641_v40, %v512_v26  ;;  %v642_v55 = vmul.f32 %v1674_v32, %v577_v41  ;;  %v643_v56 = vmul.f32 %v1674_v32, %v578_v42  ;;  %v391_v58 = vld [vmem:[%s1512_s5 + $0xa0] sm:$0xff]  ;;  %v392_v0 = vld [vmem:[%s1512_s5 + $0xa8] sm:$0xff] }
  0x9e   : > { %v390_v52 = vld [vmem:[%s1512_s5 + $0x98] sm:$0xff]  ;;  %764 = vst [vmem:[%s1521_s26 + $0x40] sm:$0xff] %v700_v46  ;;  %765 = vst [vmem:[%s1521_s26 + $0x48] sm:$0xff] %v701_v47  ;;  %v451_v59 = vsub.f32 %v323_v36, %v387_v37  ;;  %v452_v60 = vsub.f32 %v324_v38, %v388_v43  ;;  %v453_v61 = vsub.f32 %v325_v44, %v389_v45  ;;  %v515_v3 = vld [vmem:[%s1521_s26 + $0x80] sm:$0xff] }
  0x9f   : > { %766 = vst [vmem:[%s1521_s26 + $0x50] sm:$0xff] %v702_v48  ;;  %767 = vst [vmem:[%s1521_s26 + $0x58] sm:$0xff] %v703_v49  ;;  %v454_v62 = vsub.f32 %v326_v51, %v390_v52  ;;  %v706_v1 = vadd.f32 %v642_v55, %v513_v35  ;;  %v707_v2 = vadd.f32 %v643_v56, %v514_v50  ;;  %v516_v4 = vld [vmem:[%s1521_s26 + $0x88] sm:$0xff]  ;;  %v329_v7 = vld [vmem:[%s1506_s20 + $0xb0] sm:$0xff] }
  0xa0   : > { %768 = vst [vmem:[%s1521_s26 + $0x60] sm:$0xff] %v704_v53  ;;  %769 = vst [vmem:[%s1521_s26 + $0x68] sm:$0xff] %v705_v54  ;;  %v455_v5 = vsub.f32 %v327_v57, %v391_v58  ;;  %v456_v6 = vsub.f32 %v328_v63, %v392_v0  ;;  %v393_v8 = vld [vmem:[%s1512_s5 + $0xb0] sm:$0xff]  ;;  %v579_v9 = vmul.f32 %v451_v59, %v451_v59  ;;  %v330_v14 = vld [vmem:[%s1506_s20 + $0xb8] sm:$0xff] }
  0xa1   : > { %v580_v10 = vmul.f32 %v452_v60, %v452_v60  ;;  %v517_v11 = vld [vmem:[%s1521_s26 + $0x90] sm:$0xff]  ;;  %v581_v12 = vmul.f32 %v453_v61, %v453_v61  ;;  %v582_v13 = vmul.f32 %v454_v62, %v454_v62  ;;  %v394_v15 = vld [vmem:[%s1512_s5 + $0xb8] sm:$0xff]  ;;  %770 = vst [vmem:[%s1521_s26 + $0x70] sm:$0xff] %v706_v1  ;;  %771 = vst [vmem:[%s1521_s26 + $0x78] sm:$0xff] %v707_v2 }
  0xa2   : > { %v518_v16 = vld [vmem:[%s1521_s26 + $0x98] sm:$0xff]  ;;  %v519_v17 = vld [vmem:[%s1521_s26 + $0xa0] sm:$0xff]  ;;  %v583_v18 = vmul.f32 %v455_v5, %v455_v5  ;;  %v520_v19 = vld [vmem:[%s1521_s26 + $0xa8] sm:$0xff]  ;;  %v584_v20 = vmul.f32 %v456_v6, %v456_v6  ;;  %v457_v21 = vsub.f32 %v329_v7, %v393_v8  ;;  %v458_v22 = vsub.f32 %v330_v14, %v394_v15 }
  0xa3   : > { %v644_v23 = vmul.f32 %v1674_v32, %v579_v9  ;;  %v645_v24 = vmul.f32 %v1674_v32, %v580_v10  ;;  %v646_v25 = vmul.f32 %v1674_v32, %v581_v12  ;;  %v647_v26 = vmul.f32 %v1674_v32, %v582_v13  ;;  %v521_v27 = vld [vmem:[%s1521_s26 + $0xb0] sm:$0xff]  ;;  %v331_v28 = vld [vmem:[%s1506_s20 + $0xc0] sm:$0xff]  ;;  %v332_v30 = vld [vmem:[%s1506_s20 + $0xc8] sm:$0xff] }
  0xa4   : > { %v395_v29 = vld [vmem:[%s1512_s5 + $0xc0] sm:$0xff]  ;;  %v648_v31 = vmul.f32 %v1674_v32, %v583_v18  ;;  %v649_v33 = vmul.f32 %v1674_v32, %v584_v20  ;;  %v585_v34 = vmul.f32 %v457_v21, %v457_v21  ;;  %v586_v35 = vmul.f32 %v458_v22, %v458_v22  ;;  %v396_v36 = vld [vmem:[%s1512_s5 + $0xc8] sm:$0xff]  ;;  %v333_v37 = vld [vmem:[%s1506_s20 + $0xd0] sm:$0xff] }
  0xa5   : > { %v397_v38 = vld [vmem:[%s1512_s5 + $0xd0] sm:$0xff]  ;;  %v708_v39 = vadd.f32 %v644_v23, %v515_v3  ;;  %v709_v40 = vadd.f32 %v645_v24, %v516_v4  ;;  %v710_v41 = vadd.f32 %v646_v25, %v517_v11  ;;  %v711_v42 = vadd.f32 %v647_v26, %v518_v16  ;;  %v522_v43 = vld [vmem:[%s1521_s26 + $0xb8] sm:$0xff]  ;;  %v335_v50 = vld [vmem:[%s1506_s20 + $0xe0] sm:$0xff] }
  0xa6   : > { %v334_v44 = vld [vmem:[%s1506_s20 + $0xd8] sm:$0xff]  ;;  %v712_v46 = vadd.f32 %v648_v31, %v519_v17  ;;  %v713_v47 = vadd.f32 %v649_v33, %v520_v19  ;;  %v650_v48 = vmul.f32 %v1674_v32, %v585_v34  ;;  %v651_v49 = vmul.f32 %v1674_v32, %v586_v35  ;;  %v399_v51 = vld [vmem:[%s1512_s5 + $0xe0] sm:$0xff]  ;;  %v336_v56 = vld [vmem:[%s1506_s20 + $0xe8] sm:$0xff] }
  0xa7   : > { %v398_v45 = vld [vmem:[%s1512_s5 + $0xd8] sm:$0xff]  ;;  %772 = vst [vmem:[%s1521_s26 + $0x80] sm:$0xff] %v708_v39  ;;  %773 = vst [vmem:[%s1521_s26 + $0x88] sm:$0xff] %v709_v40  ;;  %v459_v52 = vsub.f32 %v331_v28, %v395_v29  ;;  %v460_v53 = vsub.f32 %v332_v30, %v396_v36  ;;  %v461_v54 = vsub.f32 %v333_v37, %v397_v38  ;;  %v400_v57 = vld [vmem:[%s1512_s5 + $0xe8] sm:$0xff] }
  0xa8   : > { %774 = vst [vmem:[%s1521_s26 + $0x90] sm:$0xff] %v710_v41  ;;  %775 = vst [vmem:[%s1521_s26 + $0x98] sm:$0xff] %v711_v42  ;;  %v462_v55 = vsub.f32 %v334_v44, %v398_v45  ;;  %v714_v58 = vadd.f32 %v650_v48, %v521_v27  ;;  %v715_v59 = vadd.f32 %v651_v49, %v522_v43  ;;  %v523_v60 = vld [vmem:[%s1521_s26 + $0xc0] sm:$0xff]  ;;  %v524_v61 = vld [vmem:[%s1521_s26 + $0xc8] sm:$0xff] }
  0xa9   : > { %776 = vst [vmem:[%s1521_s26 + $0xa0] sm:$0xff] %v712_v46  ;;  %777 = vst [vmem:[%s1521_s26 + $0xa8] sm:$0xff] %v713_v47  ;;  %v463_v62 = vsub.f32 %v335_v50, %v399_v51  ;;  %v464_v63 = vsub.f32 %v336_v56, %v400_v57  ;;  %v337_v0 = vld [vmem:[%s1506_s20 + $0xf0] sm:$0xff]  ;;  %v587_v2 = vmul.f32 %v459_v52, %v459_v52  ;;  %v338_v7 = vld [vmem:[%s1506_s20 + $0xf8] sm:$0xff] }
  0xaa   : > { %v401_v1 = vld [vmem:[%s1512_s5 + $0xf0] sm:$0xff]  ;;  %v588_v3 = vmul.f32 %v460_v53, %v460_v53  ;;  %v589_v5 = vmul.f32 %v461_v54, %v461_v54  ;;  %v590_v6 = vmul.f32 %v462_v55, %v462_v55  ;;  %v402_v8 = vld [vmem:[%s1512_s5 + $0xf8] sm:$0xff]  ;;  %778 = vst [vmem:[%s1521_s26 + $0xb0] sm:$0xff] %v714_v58  ;;  %779 = vst [vmem:[%s1521_s26 + $0xb8] sm:$0xff] %v715_v59 }
  0xab   : > { %v525_v4 = vld [vmem:[%s1521_s26 + $0xd0] sm:$0xff]  ;;  %v526_v9 = vld [vmem:[%s1521_s26 + $0xd8] sm:$0xff]  ;;  %v527_v10 = vld [vmem:[%s1521_s26 + $0xe0] sm:$0xff]  ;;  %v591_v11 = vmul.f32 %v463_v62, %v463_v62  ;;  %v592_v13 = vmul.f32 %v464_v63, %v464_v63  ;;  %v465_v14 = vsub.f32 %v337_v0, %v401_v1  ;;  %v466_v15 = vsub.f32 %v338_v7, %v402_v8 }
  0xac   : > { %v528_v12 = vld [vmem:[%s1521_s26 + $0xe8] sm:$0xff]  ;;  %v652_v16 = vmul.f32 %v1674_v32, %v587_v2  ;;  %v653_v17 = vmul.f32 %v1674_v32, %v588_v3  ;;  %v654_v18 = vmul.f32 %v1674_v32, %v589_v5  ;;  %v655_v19 = vmul.f32 %v1674_v32, %v590_v6  ;;  %v529_v20 = vld [vmem:[%s1521_s26 + $0xf0] sm:$0xff]  ;;  %v339_v21 = vld [vmem:[%s1506_s20 + $0x100] sm:$0xff] }
  0xad   : > { %v403_v22 = vld [vmem:[%s1512_s5 + $0x100] sm:$0xff]  ;;  %v340_v23 = vld [vmem:[%s1506_s20 + $0x108] sm:$0xff]  ;;  %v656_v24 = vmul.f32 %v1674_v32, %v591_v11  ;;  %v657_v25 = vmul.f32 %v1674_v32, %v592_v13  ;;  %v593_v26 = vmul.f32 %v465_v14, %v465_v14  ;;  %v594_v27 = vmul.f32 %v466_v15, %v466_v15  ;;  %v341_v29 = vld [vmem:[%s1506_s20 + $0x110] sm:$0xff] }
  0xae   : > { %v404_v28 = vld [vmem:[%s1512_s5 + $0x108] sm:$0xff]  ;;  %v405_v30 = vld [vmem:[%s1512_s5 + $0x110] sm:$0xff]  ;;  %v716_v31 = vadd.f32 %v652_v16, %v523_v60  ;;  %v717_v33 = vadd.f32 %v653_v17, %v524_v61  ;;  %v718_v34 = vadd.f32 %v654_v18, %v525_v4  ;;  %v719_v35 = vadd.f32 %v655_v19, %v526_v9  ;;  %v530_v36 = vld [vmem:[%s1521_s26 + $0xf8] sm:$0xff] }
  0xaf   : > { %v342_v37 = vld [vmem:[%s1506_s20 + $0x118] sm:$0xff]  ;;  %v720_v39 = vadd.f32 %v656_v24, %v527_v10  ;;  %v721_v40 = vadd.f32 %v657_v25, %v528_v12  ;;  %v658_v41 = vmul.f32 %v1674_v32, %v593_v26  ;;  %v659_v42 = vmul.f32 %v1674_v32, %v594_v27  ;;  %v343_v43 = vld [vmem:[%s1506_s20 + $0x120] sm:$0xff]  ;;  %v344_v49 = vld [vmem:[%s1506_s20 + $0x128] sm:$0xff] }
  0xb0   : > { %v406_v38 = vld [vmem:[%s1512_s5 + $0x118] sm:$0xff]  ;;  %v407_v44 = vld [vmem:[%s1512_s5 + $0x120] sm:$0xff]  ;;  %780 = vst [vmem:[%s1521_s26 + $0xc0] sm:$0xff] %v716_v31  ;;  %781 = vst [vmem:[%s1521_s26 + $0xc8] sm:$0xff] %v717_v33  ;;  %v467_v45 = vsub.f32 %v339_v21, %v403_v22  ;;  %v468_v46 = vsub.f32 %v340_v23, %v404_v28  ;;  %v469_v47 = vsub.f32 %v341_v29, %v405_v30 }
  0xb1   : > { %782 = vst [vmem:[%s1521_s26 + $0xd0] sm:$0xff] %v718_v34  ;;  %783 = vst [vmem:[%s1521_s26 + $0xd8] sm:$0xff] %v719_v35  ;;  %v470_v48 = vsub.f32 %v342_v37, %v406_v38  ;;  %v408_v50 = vld [vmem:[%s1512_s5 + $0x128] sm:$0xff]  ;;  %v722_v51 = vadd.f32 %v658_v41, %v529_v20  ;;  %v723_v52 = vadd.f32 %v659_v42, %v530_v36  ;;  %v531_v53 = vld [vmem:[%s1521_s26 + $0x100] sm:$0xff] }
  0xb2   : > { %784 = vst [vmem:[%s1521_s26 + $0xe0] sm:$0xff] %v720_v39  ;;  %785 = vst [vmem:[%s1521_s26 + $0xe8] sm:$0xff] %v721_v40  ;;  %v532_v54 = vld [vmem:[%s1521_s26 + $0x108] sm:$0xff]  ;;  %v471_v55 = vsub.f32 %v343_v43, %v407_v44  ;;  %v472_v56 = vsub.f32 %v344_v49, %v408_v50  ;;  %v345_v57 = vld [vmem:[%s1506_s20 + $0x130] sm:$0xff]  ;;  %v595_v59 = vmul.f32 %v467_v45, %v467_v45 }
  0xb3   : > { %v409_v58 = vld [vmem:[%s1512_s5 + $0x130] sm:$0xff]  ;;  %v596_v60 = vmul.f32 %v468_v46, %v468_v46  ;;  %v597_v62 = vmul.f32 %v469_v47, %v469_v47  ;;  %v598_v63 = vmul.f32 %v470_v48, %v470_v48  ;;  %v346_v0 = vld [vmem:[%s1506_s20 + $0x138] sm:$0xff]  ;;  %786 = vst [vmem:[%s1521_s26 + $0xf0] sm:$0xff] %v722_v51  ;;  %787 = vst [vmem:[%s1521_s26 + $0xf8] sm:$0xff] %v723_v52 }
  0xb4   : > { %v533_v61 = vld [vmem:[%s1521_s26 + $0x110] sm:$0xff]  ;;  %v410_v1 = vld [vmem:[%s1512_s5 + $0x138] sm:$0xff]  ;;  %v535_v3 = vld [vmem:[%s1521_s26 + $0x120] sm:$0xff]  ;;  %v599_v4 = vmul.f32 %v471_v55, %v471_v55  ;;  %v600_v6 = vmul.f32 %v472_v56, %v472_v56  ;;  %v473_v7 = vsub.f32 %v345_v57, %v409_v58  ;;  %v660_v9 = vmul.f32 %v1674_v32, %v595_v59 }
  0xb5   : > { %v534_v2 = vld [vmem:[%s1521_s26 + $0x118] sm:$0xff]  ;;  %v536_v5 = vld [vmem:[%s1521_s26 + $0x128] sm:$0xff]  ;;  %v474_v8 = vsub.f32 %v346_v0, %v410_v1  ;;  %v661_v10 = vmul.f32 %v1674_v32, %v596_v60  ;;  %v662_v11 = vmul.f32 %v1674_v32, %v597_v62  ;;  %v663_v12 = vmul.f32 %v1674_v32, %v598_v63  ;;  %v537_v13 = vld [vmem:[%s1521_s26 + $0x130] sm:$0xff] }
  0xb6   : > { %v347_v14 = vld [vmem:[%s1506_s20 + $0x140] sm:$0xff]  ;;  %v348_v16 = vld [vmem:[%s1506_s20 + $0x148] sm:$0xff]  ;;  %v664_v17 = vmul.f32 %v1674_v32, %v599_v4  ;;  %v665_v18 = vmul.f32 %v1674_v32, %v600_v6  ;;  %v601_v19 = vmul.f32 %v473_v7, %v473_v7  ;;  %v349_v22 = vld [vmem:[%s1506_s20 + $0x150] sm:$0xff]  ;;  %v724_v24 = vadd.f32 %v660_v9, %v531_v53 }
  0xb7   : > { %v411_v15 = vld [vmem:[%s1512_s5 + $0x140] sm:$0xff]  ;;  %v602_v20 = vmul.f32 %v474_v8, %v474_v8  ;;  %v412_v21 = vld [vmem:[%s1512_s5 + $0x148] sm:$0xff]  ;;  %v413_v23 = vld [vmem:[%s1512_s5 + $0x150] sm:$0xff]  ;;  %v725_v25 = vadd.f32 %v661_v10, %v532_v54  ;;  %v726_v26 = vadd.f32 %v662_v11, %v533_v61  ;;  %v727_v27 = vadd.f32 %v663_v12, %v534_v2 }
  0xb8   : > { %v538_v28 = vld [vmem:[%s1521_s26 + $0x138] sm:$0xff]  ;;  %v728_v31 = vadd.f32 %v664_v17, %v535_v3  ;;  %v729_v33 = vadd.f32 %v665_v18, %v536_v5  ;;  %v666_v34 = vmul.f32 %v1674_v32, %v601_v19  ;;  %v351_v36 = vld [vmem:[%s1506_s20 + $0x160] sm:$0xff]  ;;  %788 = vst [vmem:[%s1521_s26 + $0x100] sm:$0xff] %v724_v24  ;;  %v475_v38 = vsub.f32 %v347_v14, %v411_v15  ;;  %v352_v42 = vld [vmem:[%s1506_s20 + $0x168] sm:$0xff] }
  0xb9   : > { %v350_v29 = vld [vmem:[%s1506_s20 + $0x158] sm:$0xff]  ;;  %v667_v35 = vmul.f32 %v1674_v32, %v602_v20  ;;  %v415_v37 = vld [vmem:[%s1512_s5 + $0x160] sm:$0xff]  ;;  %789 = vst [vmem:[%s1521_s26 + $0x108] sm:$0xff] %v725_v25  ;;  %790 = vst [vmem:[%s1521_s26 + $0x110] sm:$0xff] %v726_v26  ;;  %v476_v39 = vsub.f32 %v348_v16, %v412_v21  ;;  %v477_v40 = vsub.f32 %v349_v22, %v413_v23 }
  0xba   : > { %v414_v30 = vld [vmem:[%s1512_s5 + $0x158] sm:$0xff]  ;;  %791 = vst [vmem:[%s1521_s26 + $0x118] sm:$0xff] %v727_v27  ;;  %v416_v43 = vld [vmem:[%s1512_s5 + $0x168] sm:$0xff]  ;;  %792 = vst [vmem:[%s1521_s26 + $0x120] sm:$0xff] %v728_v31  ;;  %v730_v44 = vadd.f32 %v666_v34, %v537_v13  ;;  %v479_v48 = vsub.f32 %v351_v36, %v415_v37  ;;  %v603_v52 = vmul.f32 %v475_v38, %v475_v38 }
  0xbb   : > { %v478_v41 = vsub.f32 %v350_v29, %v414_v30  ;;  %793 = vst [vmem:[%s1521_s26 + $0x128] sm:$0xff] %v729_v33  ;;  %v731_v45 = vadd.f32 %v667_v35, %v538_v28  ;;  %v539_v46 = vld [vmem:[%s1521_s26 + $0x140] sm:$0xff]  ;;  %v540_v47 = vld [vmem:[%s1521_s26 + $0x148] sm:$0xff]  ;;  %v480_v49 = vsub.f32 %v352_v42, %v416_v43  ;;  %v353_v50 = vld [vmem:[%s1506_s20 + $0x170] sm:$0xff]  ;;  %v604_v53 = vmul.f32 %v476_v39, %v476_v39 }
  0xbc   : > { %v417_v51 = vld [vmem:[%s1512_s5 + $0x170] sm:$0xff]  ;;  %v605_v55 = vmul.f32 %v477_v40, %v477_v40  ;;  %v354_v57 = vld [vmem:[%s1506_s20 + $0x178] sm:$0xff]  ;;  %794 = vst [vmem:[%s1521_s26 + $0x130] sm:$0xff] %v730_v44  ;;  %v543_v60 = vld [vmem:[%s1521_s26 + $0x160] sm:$0xff]  ;;  %v607_v61 = vmul.f32 %v479_v48, %v479_v48  ;;  %v668_v2 = vmul.f32 %v1674_v32, %v603_v52 }
  0xbd   : > { %v541_v54 = vld [vmem:[%s1521_s26 + $0x150] sm:$0xff]  ;;  %v606_v56 = vmul.f32 %v478_v41, %v478_v41  ;;  %v418_v58 = vld [vmem:[%s1512_s5 + $0x178] sm:$0xff]  ;;  %795 = vst [vmem:[%s1521_s26 + $0x138] sm:$0xff] %v731_v45  ;;  %v544_v62 = vld [vmem:[%s1521_s26 + $0x168] sm:$0xff]  ;;  %v608_v63 = vmul.f32 %v480_v49, %v480_v49  ;;  %v481_v0 = vsub.f32 %v353_v50, %v417_v51  ;;  %v669_v3 = vmul.f32 %v1674_v32, %v604_v53 }
  0xbe   : > { %v542_v59 = vld [vmem:[%s1521_s26 + $0x158] sm:$0xff]  ;;  %v482_v1 = vsub.f32 %v354_v57, %v418_v58  ;;  %v670_v4 = vmul.f32 %v1674_v32, %v605_v55  ;;  %v545_v6 = vld [vmem:[%s1521_s26 + $0x170] sm:$0xff]  ;;  %v355_v7 = vld [vmem:[%s1506_s20 + $0x180] sm:$0xff]  ;;  %v672_v10 = vmul.f32 %v1674_v32, %v607_v61  ;;  %v732_v17 = vadd.f32 %v668_v2, %v539_v46 }
  0xbf   : > { %v671_v5 = vmul.f32 %v1674_v32, %v606_v56  ;;  %v419_v8 = vld [vmem:[%s1512_s5 + $0x180] sm:$0xff]  ;;  %v356_v9 = vld [vmem:[%s1506_s20 + $0x188] sm:$0xff]  ;;  %v673_v11 = vmul.f32 %v1674_v32, %v608_v63  ;;  %v609_v12 = vmul.f32 %v481_v0, %v481_v0  ;;  %v357_v15 = vld [vmem:[%s1506_s20 + $0x190] sm:$0xff]  ;;  %v733_v18 = vadd.f32 %v669_v3, %v540_v47 }
  0xc0   : > { %v610_v13 = vmul.f32 %v482_v1, %v482_v1  ;;  %v420_v14 = vld [vmem:[%s1512_s5 + $0x188] sm:$0xff]  ;;  %v421_v16 = vld [vmem:[%s1512_s5 + $0x190] sm:$0xff]  ;;  %v734_v19 = vadd.f32 %v670_v4, %v541_v54  ;;  %v546_v21 = vld [vmem:[%s1521_s26 + $0x178] sm:$0xff]  ;;  %v736_v24 = vadd.f32 %v672_v10, %v543_v60  ;;  %796 = vst [vmem:[%s1521_s26 + $0x140] sm:$0xff] %v732_v17  ;;  %v483_v30 = vsub.f32 %v355_v7, %v419_v8 }
  0xc1   : > { %v735_v20 = vadd.f32 %v671_v5, %v542_v59  ;;  %v358_v22 = vld [vmem:[%s1506_s20 + $0x198] sm:$0xff]  ;;  %v737_v25 = vadd.f32 %v673_v11, %v544_v62  ;;  %v674_v26 = vmul.f32 %v1674_v32, %v609_v12  ;;  %v359_v28 = vld [vmem:[%s1506_s20 + $0x1a0] sm:$0xff]  ;;  %797 = vst [vmem:[%s1521_s26 + $0x148] sm:$0xff] %v733_v18  ;;  %v484_v31 = vsub.f32 %v356_v9, %v420_v14  ;;  %v360_v35 = vld [vmem:[%s1506_s20 + $0x1a8] sm:$0xff] }
  0xc2   : > { %v422_v23 = vld [vmem:[%s1512_s5 + $0x198] sm:$0xff]  ;;  %v675_v27 = vmul.f32 %v1674_v32, %v610_v13  ;;  %v423_v29 = vld [vmem:[%s1512_s5 + $0x1a0] sm:$0xff]  ;;  %798 = vst [vmem:[%s1521_s26 + $0x150] sm:$0xff] %v734_v19  ;;  %v485_v33 = vsub.f32 %v357_v15, %v421_v16  ;;  %v424_v36 = vld [vmem:[%s1512_s5 + $0x1a8] sm:$0xff]  ;;  %v611_v45 = vmul.f32 %v483_v30, %v483_v30 }
  0xc3   : > { %799 = vst [vmem:[%s1521_s26 + $0x158] sm:$0xff] %v735_v20  ;;  %v486_v34 = vsub.f32 %v358_v22, %v422_v23  ;;  %800 = vst [vmem:[%s1521_s26 + $0x160] sm:$0xff] %v736_v24  ;;  %v738_v37 = vadd.f32 %v674_v26, %v545_v6  ;;  %v547_v39 = vld [vmem:[%s1521_s26 + $0x180] sm:$0xff]  ;;  %v548_v40 = vld [vmem:[%s1521_s26 + $0x188] sm:$0xff]  ;;  %v487_v41 = vsub.f32 %v359_v28, %v423_v29 }
  0xc4   : > { %801 = vst [vmem:[%s1521_s26 + $0x168] sm:$0xff] %v737_v25  ;;  %v739_v38 = vadd.f32 %v675_v27, %v546_v21  ;;  %v488_v42 = vsub.f32 %v360_v35, %v424_v36  ;;  %v361_v43 = vld [vmem:[%s1506_s20 + $0x1b0] sm:$0xff]  ;;  %v612_v46 = vmul.f32 %v484_v31, %v484_v31  ;;  %v613_v48 = vmul.f32 %v485_v33, %v485_v33  ;;  %v362_v50 = vld [vmem:[%s1506_s20 + $0x1b8] sm:$0xff]  ;;  %v551_v53 = vld [vmem:[%s1521_s26 + $0x1a0] sm:$0xff] }
  0xc5   : > { %v425_v44 = vld [vmem:[%s1512_s5 + $0x1b0] sm:$0xff]  ;;  %v614_v49 = vmul.f32 %v486_v34, %v486_v34  ;;  %v426_v51 = vld [vmem:[%s1512_s5 + $0x1b8] sm:$0xff]  ;;  %802 = vst [vmem:[%s1521_s26 + $0x170] sm:$0xff] %v738_v37  ;;  %v615_v54 = vmul.f32 %v487_v41, %v487_v41  ;;  %v552_v55 = vld [vmem:[%s1521_s26 + $0x1a8] sm:$0xff]  ;;  %v676_v59 = vmul.f32 %v1674_v32, %v611_v45 }
  0xc6   : > { %v549_v47 = vld [vmem:[%s1521_s26 + $0x190] sm:$0xff]  ;;  %803 = vst [vmem:[%s1521_s26 + $0x178] sm:$0xff] %v739_v38  ;;  %v550_v52 = vld [vmem:[%s1521_s26 + $0x198] sm:$0xff]  ;;  %v616_v56 = vmul.f32 %v488_v42, %v488_v42  ;;  %v489_v57 = vsub.f32 %v361_v43, %v425_v44  ;;  %v490_v58 = vsub.f32 %v362_v50, %v426_v51  ;;  %v677_v60 = vmul.f32 %v1674_v32, %v612_v46  ;;  %v363_v0 = vld [vmem:[%s1506_s20 + $0x1c0] sm:$0xff] }
  0xc7   : > { %v678_v61 = vmul.f32 %v1674_v32, %v613_v48  ;;  %v679_v62 = vmul.f32 %v1674_v32, %v614_v49  ;;  %v553_v63 = vld [vmem:[%s1521_s26 + $0x1b0] sm:$0xff]  ;;  %v427_v1 = vld [vmem:[%s1512_s5 + $0x1c0] sm:$0xff]  ;;  %v364_v2 = vld [vmem:[%s1506_s20 + $0x1c8] sm:$0xff]  ;;  %v680_v3 = vmul.f32 %v1674_v32, %v615_v54  ;;  %v740_v10 = vadd.f32 %v676_v59, %v547_v39 }
  0xc8   : > { %v681_v4 = vmul.f32 %v1674_v32, %v616_v56  ;;  %v617_v5 = vmul.f32 %v489_v57, %v489_v57  ;;  %v618_v6 = vmul.f32 %v490_v58, %v490_v58  ;;  %v428_v7 = vld [vmem:[%s1512_s5 + $0x1c8] sm:$0xff]  ;;  %v365_v8 = vld [vmem:[%s1506_s20 + $0x1d0] sm:$0xff]  ;;  %v741_v11 = vadd.f32 %v677_v60, %v548_v40  ;;  %v554_v14 = vld [vmem:[%s1521_s26 + $0x1b8] sm:$0xff] }
  0xc9   : > { %v429_v9 = vld [vmem:[%s1512_s5 + $0x1d0] sm:$0xff]  ;;  %v742_v12 = vadd.f32 %v678_v61, %v549_v47  ;;  %v743_v13 = vadd.f32 %v679_v62, %v550_v52  ;;  %v366_v15 = vld [vmem:[%s1506_s20 + $0x1d8] sm:$0xff]  ;;  %v744_v17 = vadd.f32 %v680_v3, %v551_v53  ;;  %v367_v21 = vld [vmem:[%s1506_s20 + $0x1e0] sm:$0xff]  ;;  %804 = vst [vmem:[%s1521_s26 + $0x180] sm:$0xff] %v740_v10  ;;  %v491_v23 = vsub.f32 %v363_v0, %v427_v1 }
  0xca   : > { %v430_v16 = vld [vmem:[%s1512_s5 + $0x1d8] sm:$0xff]  ;;  %v745_v18 = vadd.f32 %v681_v4, %v552_v55  ;;  %v682_v19 = vmul.f32 %v1674_v32, %v617_v5  ;;  %v683_v20 = vmul.f32 %v1674_v32, %v618_v6  ;;  %v431_v22 = vld [vmem:[%s1512_s5 + $0x1e0] sm:$0xff]  ;;  %805 = vst [vmem:[%s1521_s26 + $0x188] sm:$0xff] %v741_v11  ;;  %v492_v24 = vsub.f32 %v364_v2, %v428_v7  ;;  %v368_v27 = vld [vmem:[%s1506_s20 + $0x1e8] sm:$0xff] }
  0xcb   : > { %806 = vst [vmem:[%s1521_s26 + $0x190] sm:$0xff] %v742_v12  ;;  %807 = vst [vmem:[%s1521_s26 + $0x198] sm:$0xff] %v743_v13  ;;  %v493_v25 = vsub.f32 %v365_v8, %v429_v9  ;;  %v494_v26 = vsub.f32 %v366_v15, %v430_v16  ;;  %v432_v28 = vld [vmem:[%s1512_s5 + $0x1e8] sm:$0xff]  ;;  %v495_v31 = vsub.f32 %v367_v21, %v431_v22  ;;  %v369_v34 = vld [vmem:[%s1506_s20 + $0x1f0] sm:$0xff] }
  0xcc   : > { %808 = vst [vmem:[%s1521_s26 + $0x1a0] sm:$0xff] %v744_v17  ;;  %809 = vst [vmem:[%s1521_s26 + $0x1a8] sm:$0xff] %v745_v18  ;;  %v746_v29 = vadd.f32 %v682_v19, %v553_v63  ;;  %v747_v30 = vadd.f32 %v683_v20, %v554_v14  ;;  %v496_v33 = vsub.f32 %v368_v27, %v432_v28  ;;  %v433_v35 = vld [vmem:[%s1512_s5 + $0x1f0] sm:$0xff]  ;;  %v555_v36 = vld [vmem:[%s1521_s26 + $0x1c0] sm:$0xff] }
  0xcd   : > { %v619_v37 = vmul.f32 %v491_v23, %v491_v23  ;;  %v620_v38 = vmul.f32 %v492_v24, %v492_v24  ;;  %v621_v39 = vmul.f32 %v493_v25, %v493_v25  ;;  %v622_v40 = vmul.f32 %v494_v26, %v494_v26  ;;  %v370_v41 = vld [vmem:[%s1506_s20 + $0x1f8] sm:$0xff]  ;;  %v556_v43 = vld [vmem:[%s1521_s26 + $0x1c8] sm:$0xff]  ;;  %v557_v44 = vld [vmem:[%s1521_s26 + $0x1d0] sm:$0xff] }
  0xce   : > { %v434_v42 = vld [vmem:[%s1512_s5 + $0x1f8] sm:$0xff]  ;;  %810 = vst [vmem:[%s1521_s26 + $0x1b0] sm:$0xff] %v746_v29  ;;  %811 = vst [vmem:[%s1521_s26 + $0x1b8] sm:$0xff] %v747_v30  ;;  %v623_v46 = vmul.f32 %v495_v31, %v495_v31  ;;  %v624_v47 = vmul.f32 %v496_v33, %v496_v33  ;;  %v497_v48 = vsub.f32 %v369_v34, %v433_v35  ;;  %v559_v54 = vld [vmem:[%s1521_s26 + $0x1e0] sm:$0xff] }
  0xcf   : > { %v558_v45 = vld [vmem:[%s1521_s26 + $0x1d8] sm:$0xff]  ;;  %v498_v49 = vsub.f32 %v370_v41, %v434_v42  ;;  %v684_v50 = vmul.f32 %v1674_v32, %v619_v37  ;;  %v685_v51 = vmul.f32 %v1674_v32, %v620_v38  ;;  %v686_v52 = vmul.f32 %v1674_v32, %v621_v39  ;;  %v560_v55 = vld [vmem:[%s1521_s26 + $0x1e8] sm:$0xff]  ;;  %v561_v0 = vld [vmem:[%s1521_s26 + $0x1f0] sm:$0xff] }
  0xd0   : > { %v687_v53 = vmul.f32 %v1674_v32, %v622_v40  ;;  %v688_v56 = vmul.f32 %v1674_v32, %v623_v46  ;;  %v689_v57 = vmul.f32 %v1674_v32, %v624_v47  ;;  %v625_v58 = vmul.f32 %v497_v48, %v497_v48  ;;  %v562_v1 = vld [vmem:[%s1521_s26 + $0x1f8] sm:$0xff] }
  0xd1   : > { %v626_v59 = vmul.f32 %v498_v49, %v498_v49  ;;  %v748_v60 = vadd.f32 %v684_v50, %v555_v36  ;;  %v749_v61 = vadd.f32 %v685_v51, %v556_v43  ;;  %v750_v62 = vadd.f32 %v686_v52, %v557_v44 }
  0xd2   : > { %v751_v63 = vadd.f32 %v687_v53, %v558_v45  ;;  %v752_v2 = vadd.f32 %v688_v56, %v559_v54  ;;  %v753_v3 = vadd.f32 %v689_v57, %v560_v55  ;;  %v690_v4 = vmul.f32 %v1674_v32, %v625_v58 }
  0xd3   : > { %v691_v5 = vmul.f32 %v1674_v32, %v626_v59  ;;  %812 = vst [vmem:[%s1521_s26 + $0x1c0] sm:$0xff] %v748_v60  ;;  %813 = vst [vmem:[%s1521_s26 + $0x1c8] sm:$0xff] %v749_v61 }
  0xd4   : > { %814 = vst [vmem:[%s1521_s26 + $0x1d0] sm:$0xff] %v750_v62  ;;  %815 = vst [vmem:[%s1521_s26 + $0x1d8] sm:$0xff] %v751_v63  ;;  %v754_v6 = vadd.f32 %v690_v4, %v561_v0 }
  0xd5   : > { %816 = vst [vmem:[%s1521_s26 + $0x1e0] sm:$0xff] %v752_v2  ;;  %817 = vst [vmem:[%s1521_s26 + $0x1e8] sm:$0xff] %v753_v3  ;;  %v755_v7 = vadd.f32 %v691_v5, %v562_v1 }
  0xd6   : > { %818 = vst [vmem:[%s1521_s26 + $0x1f0] sm:$0xff] %v754_v6 }
  0xd7   : > { %819 = vst [vmem:[%s1521_s26 + $0x1f8] sm:$0xff] %v755_v7 }
  0xd8   : > { %1160 = shalt.err (!%p1157_p4)
}
  0xd9   : > { %s1161_s20 = scalar_lea.hbm %s1978_s22, 8192  ;;  %s1165_s0 = scalar_lea.hbm %s2051_s2, 16384 }
  0xda   : > { %p1162_p8 = scmp.ne.s32.totalorder %s1978_s22, %s1161_s20  ;;  %p1166_p3 = scmp.lt.u32.totalorder %s1978_s22, %s2051_s2 }
  0xdb   : > { %p1167_p6 = scmp.lt.u32.totalorder %s1165_s0, %s1161_s20  ;;  %p1169_p1 = scmp.lt.u32.totalorder %s1161_s20, %s1978_s22 }
  0xdc   : > { %p1163_p5 = pnand %p1162_p8, %p2076_p10 }
  0xdd   : > { %p1168_p9 = por %p1167_p6, %p1166_p3 }
  0xde   : > { %p1164_p7 = pneg %p1163_p5 }
  0xdf   : > { %p1170_p11 = por %p1169_p1, %p1168_p9 }
  0xe1   : > { %p1171_p12 = pnand %p1170_p11, %p1164_p7 }
  0xe3   : > { %1174 = shalt.err (!%p1171_p12)
}
  0xe4   : > { %s1281_s28 = smov 128   ;;  %s1282_s29 = smov 8  }
  0xe5   : > { %979 = dma.vmem_to_hbm [thread:$0]  (%p2076_p10), %s1980_s3, 8192, %s1978_s22, %s1988_s25, %s1281_s28, %s1281_s28, %s1282_s29  }
  0xe6 PF: > { %p993_p2 = scmp.ge.s32.totalorder %s1273_s19, 2  ;;  %s849_s27 = sand.u32 1, %s1233_s9  }
  0xe7   : > { %p2077_p13 = scmp.ne.s32.totalorder %s2068_s24, 0  ;;  %s850_s15 = scalar_lea.sflag [#allocation4], %s849_s27 }
  0xe9   : > { %p989_p0 = pnand %p993_p2, %p2077_p13 }
  0xeb   : > { %1228 = dma.done.wait (!%p989_p0), %s850_s15, 8192  }
  0xec   : > { %1230 = vsyncadd (!%p989_p0), %s850_s15, 4294959104  ;;  %s21_s19 = sadd.s32 1, %s1273_s19   ;;  %s2078_s15 = sld [smem:[#allocation11_spill]] }
  0xed   : > { %p18_p4 = scmp.ge.s32.totalorder %s21_s19, 6   ;;  %s2079_s16 = sld [smem:[#allocation12_spill]] }
  0xee   : > { %s2080_s17 = sld [smem:[#allocation13_spill]]  ;;  %s2081_s18 = sld [smem:[#allocation14_spill]] }
  0xef   : > { %s2082_s9 = smov %s1237_s10  ;;  %s2083_s10 = smov %s1241_s11 }
  0xf0   : > { %s2084_s11 = smov %s1386_s6  ;;  %s2085_s12 = smov %s1249_s13 }
  0xf1   : > { %s2086_s13 = smov %s1253_s14  ;;  %s2087_s14 = smov %s1389_s7 }
  0xf2   :  { %20 = sbr.rel (!%p18_p4) target bundleno = 13 (0xd), region = 90 }
  0xf9   :  { %855 = vsyncpa [#allocation3], 1 }
  0xfa   :  { %857 = vsyncpa [#allocation3 + $0x1], 1 }
  0xfb   :  { %858 = vsyncpa [#allocation6], 1 }
  0xfc   :  { %860 = vsyncpa [#allocation6 + $0x1], 1 }
  0xfd   :  { %861 = vsyncpa [#allocation4], 1 }
  0xfe   :  { %863 = vsyncpa [#allocation4 + $0x1], 1 }

</bundles_post_ra>
